<compile_context>
chip_gen: v6e
topology: v6e:2x2x1
jax: 0.10.0
libtpu: 0.0.40
codegen_flags: <defaults>
</compile_context>

<pallas_src>
import functools

import jax
import jax.numpy as jnp
from jax.experimental import pallas as pl
from jax.experimental.pallas import tpu as pltpu

IN_FEATURES = 6
OUT_FEATURES = 1

_TB_MAX = 128 * 1024          # max batch-tile lanes (~4 MiB/buffer in VMEM)
_MIN_TILES = 4                # aim for >=4 grid steps (2 per v7x TensorCore)
_XLA_FALLBACK_ROWS = 16384    # below this, a fused XLA matvec beats pallas_call


def _round_up(x, m):
    return ((x + m - 1) // m) * m


def _critic_kernel(wb_ref, xT_ref, o_ref):
    """One batch tile of y = x @ W.T + b, lane-dense, pure VPU + XLU.

    wb_ref : VMEM (IN_FEATURES + 2, 1) f32 -- rows 0..5 = w, row 6 = bias
    xT_ref : VMEM (IN_FEATURES, TB)        -- batch on the lane (fast) axis
    o_ref  : VMEM (OUT_FEATURES, TB)       -- lane-dense output tile
    """
    x = xT_ref[...]                                     # (6, TB)
    w = wb_ref[0:IN_FEATURES, :]                        # (6, 1), lane-broadcast
    b = wb_ref[IN_FEATURES:IN_FEATURES + 1, :]          # (1, 1)
    acc = jnp.sum(x * w, axis=0, keepdims=True)         # XLU sublane reduce -> (1, TB)
    o_ref[...] = (acc + b).astype(o_ref.dtype)


@functools.partial(
    jax.jit,
    static_argnames=("tile_b_max", "min_pallas_rows", "x_is_feature_major"),
)
def dummy_critic_forward(x, weight, bias, *, tile_b_max=_TB_MAX,
                         min_pallas_rows=_XLA_FALLBACK_ROWS,
                         x_is_feature_major=False):
    """Pallas equivalent of DummyCriticModel.forward (nn.Linear(6, 1)).

    x:      (B, 6)  (or (6, B) if x_is_feature_major=True)
    weight: (1, 6)  (PyTorch convention: (out_features, in_features))
    bias:   (1,)
    returns (B, 1)
    """
    assert weight.shape == (OUT_FEATURES, IN_FEATURES), "kernel only supports out_features == 1"
    assert bias.shape == (OUT_FEATURES,)

    if x_is_feature_major:
        in_f, B = x.shape
    else:
        B, in_f = x.shape
    assert in_f == IN_FEATURES

    # --- small-batch fast path: pallas_call fixed cost dwarfs the work ------
    if B < min_pallas_rows:
        x_row = x.T if x_is_feature_major else x
        return (x_row @ weight.T + bias).astype(x.dtype)

    # --- tile sizing: big lane tiles, but keep >= _MIN_TILES grid steps -----
    b_ceil = _round_up(B, 128)
    tb = min(_round_up(max(tile_b_max, 128), 128),
             max(128, _round_up(-(-b_ceil // _MIN_TILES), 128)))
    b_pad = _round_up(B, tb)
    grid = (b_pad // tb,)

    # --- layout plumbing (XLA side) ------------------------------------------
    # Feature-major producers skip the transpose pass entirely.
    xT = x if x_is_feature_major else x.T              # (6, B)
    if b_pad != B:
        xT = jnp.pad(xT, ((0, 0), (0, b_pad - B)))     # (6, b_pad)

    # Params: rows 0..5 weights, row 6 bias, row 7 zero pad -> (8, 1) f32.
    wb = jnp.concatenate([
        weight.reshape(-1).astype(jnp.float32),
        bias.reshape(-1).astype(jnp.float32),
        jnp.zeros((1,), jnp.float32),
    ]).reshape(IN_FEATURES + 2, 1)

    itemsize = jnp.dtype(x.dtype).itemsize
    cost = pl.CostEstimate(
        flops=2 * b_pad * IN_FEATURES,
        transcendentals=0,
        bytes_accessed=(IN_FEATURES * b_pad * itemsize        # x read (padded)
                        + OUT_FEATURES * b_pad * itemsize      # y write
                        + (IN_FEATURES + 2) * 4),              # params
    )

    yT = pl.pallas_call(
        _critic_kernel,
        out_shape=jax.ShapeDtypeStruct((OUT_FEATURES, b_pad), x.dtype),
        grid_spec=pltpu.PrefetchScalarGridSpec(
            num_scalar_prefetch=0,
            grid=grid,
            in_specs=[
                # params: constant block index -> fetched once, stays resident.
                pl.BlockSpec((IN_FEATURES + 2, 1), lambda i: (0, 0)),
                # x tile: (6, TB), batch tiled along the lane axis.
                pl.BlockSpec((IN_FEATURES, tb), lambda i: (0, i)),
            ],
            out_specs=pl.BlockSpec((OUT_FEATURES, tb), lambda i: (0, i)),
        ),
        compiler_params=pltpu.CompilerParams(
            dimension_semantics=("parallel",),   # shard batch tiles across TCs
            vmem_limit_bytes=32 * 1024 * 1024,   # ~16 MiB used at max tile
        ),
        cost_estimate=cost,
    )(wb, xT)

    # (1, b_pad) -> (B, 1), dropping padded (bias-only) columns.
    return yT[:, :B].T


if __name__ == "__main__":
    key = jax.random.PRNGKey(0)
    kx, kw, kb, kx2 = jax.random.split(key, 4)

    # Deterministic parameters matching nn.Linear(6, 1) shapes.
    weight = jax.random.uniform(kw, (OUT_FEATURES, IN_FEATURES), jnp.float32, -0.5, 0.5)
    bias = jax.random.uniform(kb, (OUT_FEATURES,), jnp.float32, -0.5, 0.5)

    # Small case (matches the test's tiny batch); force the Pallas path so the
    # kernel itself is compiled and executed.
    B = 8
    x = jax.random.normal(kx, (B, IN_FEATURES), jnp.float32)
    y = jax.block_until_ready(dummy_critic_forward(x, weight, bias, min_pallas_rows=0))
    y_ref = x @ weight.T + bias
    assert y.shape == (B, OUT_FEATURES)
    assert jnp.allclose(y, y_ref, atol=1e-5, rtol=1e-5)

    # Ragged multi-tile batch: exercises padding + multi-step grid pipelining.
    B2 = 1029
    x2 = jax.random.normal(kx2, (B2, IN_FEATURES), jnp.float32)
    y2 = jax.block_until_ready(dummy_critic_forward(x2, weight, bias, min_pallas_rows=0))
    y2_ref = x2 @ weight.T + bias
    assert y2.shape == (B2, OUT_FEATURES)
    assert jnp.allclose(y2, y2_ref, atol=1e-5, rtol=1e-5)

    # Feature-major producer layout: no wrapper transpose / extra HBM pass.
    y3 = jax.block_until_ready(
        dummy_critic_forward(x2.T, weight, bias, min_pallas_rows=0,
                             x_is_feature_major=True))
    assert jnp.allclose(y3, y2_ref, atol=1e-5, rtol=1e-5)

    # Default dispatch: tiny batches take the fused XLA fast path.
    y4 = jax.block_until_ready(dummy_critic_forward(x, weight, bias))
    assert jnp.allclose(y4, y_ref, atol=1e-5, rtol=1e-5)

    print("KERNEL_OK")
</pallas_src>

<mosaic_0001>
module attributes {stable_mosaic.version = 11 : i64} {
  func.func @_critic_kernel(%arg0: i32, %arg1: memref<8x1xf32, #tpu.memory_space<vmem>>, %arg2: memref<6x128xf32, #tpu.memory_space<vmem>>, %arg3: memref<1x128xf32, #tpu.memory_space<vmem>>) attributes {dimension_semantics = [#tpu.dimension_semantics<parallel>], iteration_bounds = array<i64: 1>, scalar_prefetch = 0 : i64, scratch_operands = 0 : i64, tpu.core_type = #tpu.core_type<tc>, window_params = [{pipeline_mode = #tpu.pipeline_mode<synchronous>, transform_indices = @transform_0, window_bounds = array<i64: 8, 1>}, {transform_indices = @transform_1, window_bounds = array<i64: 6, 128>}, {transform_indices = @transform_2, window_bounds = array<i64: 1, 128>}]} {
    %c0 = arith.constant 0 : index
    %c0_0 = arith.constant 0 : index
    %0 = vector.load %arg2[%c0, %c0_0] : memref<6x128xf32, #tpu.memory_space<vmem>>, vector<6x128xf32>
    %c0_1 = arith.constant 0 : index
    %c0_2 = arith.constant 0 : index
    %1 = vector.load %arg1[%c0_1, %c0_2] : memref<8x1xf32, #tpu.memory_space<vmem>>, vector<6x1xf32>
    %c6 = arith.constant 6 : index
    %c0_3 = arith.constant 0 : index
    %2 = vector.load %arg1[%c6, %c0_3] : memref<8x1xf32, #tpu.memory_space<vmem>>, vector<1x1xf32>
    %3 = vector.broadcast %1 : vector<6x1xf32> to vector<6x128xf32>
    %4 = arith.mulf %0, %3 : vector<6x128xf32>
    %cst = arith.constant dense<0.000000e+00> : vector<128xf32>
    %5 = vector.multi_reduction <add>, %4, %cst [0] : vector<6x128xf32> to vector<128xf32>
    %6 = vector.shape_cast %5 : vector<128xf32> to vector<1x128xf32>
    %7 = vector.broadcast %2 : vector<1x1xf32> to vector<1x128xf32>
    %8 = arith.addf %6, %7 : vector<1x128xf32>
    %c0_4 = arith.constant 0 : index
    %c0_5 = arith.constant 0 : index
    %9 = vector.load %arg3[%c0_4, %c0_5] : memref<1x128xf32, #tpu.memory_space<vmem>>, vector<1x128xf32>
    tpu.vector_store %arg3[%c0_4, %c0_5], %8 {strides = array<i32>} : memref<1x128xf32, #tpu.memory_space<vmem>>, vector<1x128xf32>,
    return
  }
  func.func @transform_0(%arg0: i32) -> (i32, i32) {
    %c0_i32 = arith.constant 0 : i32
    %c0_i32_0 = arith.constant 0 : i32
    %c0_i32_1 = arith.constant 0 : i32
    return %c0_i32, %c0_i32_0 : i32, i32
  }
  func.func @transform_1(%arg0: i32) -> (i32, i32) {
    %c0_i32 = arith.constant 0 : i32
    %c0_i32_0 = arith.constant 0 : i32
    return %c0_i32, %arg0 : i32, i32
  }
  func.func @transform_2(%arg0: i32) -> (i32, i32) {
    %c0_i32 = arith.constant 0 : i32
    %c0_i32_0 = arith.constant 0 : i32
    return %c0_i32, %arg0 : i32, i32
  }
}

</mosaic_0001>

<bundles_post_ra>
// kernel: dummy_critic_forward.1
= control target key start
LH: loop header
LB: loop body
LE: loop exit
PB: predicated region body
PF: predicated region fallthrough
CT: control target
= control target key end

     0   :  { %v41_v0 = vmov 0   ;;  %vm20_vm0 = vcmask 1045504   ;;  %s69_s0 = inlined_call_operand.vmem [shape: f32[8,1], index: 0, kind: input, shape index: {}]   ;;  %s70_s1 = inlined_call_operand.vmem [shape: f32[6,128], index: 1, kind: input, shape index: {}]   ;;  %s71_s2 = inlined_call_operand.vmem [shape: f32[1,128], index: 2, kind: output, shape index: {}]  }
   0x1   :  { %40 = vset.pattern.permute.xlu0 %v41_v0  ;;  %v12_v1 = vld [vmem:[%s69_s0] sm:$0x3f]  ;;  %v13_v2 = vld [vmem:[%s69_s0 + $0x6] sm:$0x1] }
   0x2   :  { %16 = vperm.xlu0 %40, %v12_v1   ;;  %v11_v3 = vld [vmem:[%s70_s1] sm:$0x3f] }
   0x6   :  { %30 = vperm.xlu0 %40, %v13_v2  }
  0x7d   :  { %v17_v4 = vpop.permute.xlu0 %16 }
  0x7e   :  { %v19_v5 = vmul.f32 %v17_v4, %v11_v3 }
  0x80   :  { %v21_v6 = vsel %vm20_vm0, %v19_v5, 0.0 }
  0x81   :  { %v22_v7 = vrot.slane %v21_v6, 4  ;;  %v31_v13 = vpop.permute.xlu0 %30 }
  0x83   :  { %v23_v8 = vadd.f32 %v22_v7, %v21_v6 }
  0x85   :  { %v24_v9 = vrot.slane %v23_v8, 2 }
  0x87   :  { %v25_v10 = vadd.f32 %v24_v9, %v23_v8 }
  0x89   :  { %v26_v11 = vrot.slane %v25_v10, 1 }
  0x8b   :  { %v27_v12 = vadd.f32 %v26_v11, %v25_v10 }
  0x8d   :  { %v33_v14 = vadd.f32 %v31_v13, %v27_v12 }
  0x8f   :  { %34 = vst [vmem:[%s71_s2] sm:$0x1] %v33_v14 }

</bundles_post_ra>
